<compile_context>
chip_gen: v6e
topology: v6e:2x2x1
jax: 0.10.0
libtpu: 0.0.40
codegen_flags: <defaults>
</compile_context>

<pallas_src>
import functools
import math

import jax
import jax.numpy as jnp
from jax.experimental import pallas as pl
from jax.experimental.pallas import tpu as pltpu


# ----------------------------------------------------------------------------
# Pre-pass: L2-normalize rows and fold in the temperature scale.
# Each operand is scaled by 1/sqrt(temperature) so q.k == (fn.fn)/temperature.
# ----------------------------------------------------------------------------
def _normalize_scale_kernel(f_ref, o_ref, *, scale):
    f = f_ref[...].astype(jnp.float32)                       # [rb, Dp]
    ss = jnp.sum(f * f, axis=1, keepdims=True)                # [rb, 1]
    # PyTorch F.normalize clamps the *norm* at eps=1e-12 -> clamp ss at eps^2.
    inv = jax.lax.rsqrt(jnp.maximum(ss, 1e-24)) * scale        # rsqrt -> EUP slot
    o_ref[...] = (f * inv).astype(o_ref.dtype)


# ----------------------------------------------------------------------------
# Main kernel: one [tm, tn] tile of the similarity matrix per grid step.
# Online LSE + masked similarity sum accumulated in [tm, 1] VMEM scratch.
# ----------------------------------------------------------------------------
def _contrastive_tile_kernel(q_ref, k_ref, lrow_ref, lcol_ref, npos_ref, out_ref,
                             m_sc, l_sc, msum_sc,
                             *, n_valid, n_padded, tn, k_resident):
    j = pl.program_id(1)

    @pl.when(j == 0)
    def _():
        m_sc[...] = jnp.full_like(m_sc, -1e30)
        l_sc[...] = jnp.zeros_like(l_sc)
        msum_sc[...] = jnp.zeros_like(msum_sc)

    col0 = pl.multiple_of(j * tn, tn)
    if k_resident:
        # k is a single resident [Bp, Dp] slab; slice the current column tile.
        k_tile = k_ref[pl.ds(col0, tn), :]
    else:
        k_tile = k_ref[...]
    # Column labels are always resident as one [1, Bp] row.
    lcol_tile = lcol_ref[:, pl.ds(col0, tn)]                   # [1, tn]

    # Similarity tile on the MXU: contract dim 1 of both operands (NT form),
    # f32 accumulation regardless of operand dtype (bf16 or f32).
    sim = jax.lax.dot_general(
        q_ref[...], k_tile,
        dimension_numbers=(((1,), (1,)), ((), ())),
        preferred_element_type=jnp.float32)                    # [tm, tn]

    if n_valid != n_padded:
        # Padding exists: padded columns must not inflate the softmax denominator.
        col_idx = col0 + jax.lax.broadcasted_iota(jnp.int32, (1, tn), 1)
        sim_lse = jnp.where(col_idx < n_valid, sim, -1e30)
    else:
        # Trace-time specialization: no padding -> no masks at all.
        sim_lse = sim

    # Online log-sum-exp over the column tiles.
    m_prev = m_sc[...]
    m_new = jnp.maximum(m_prev, jnp.max(sim_lse, axis=1, keepdims=True))
    alpha = jnp.exp(m_prev - m_new)
    l_sc[...] = alpha * l_sc[...] + jnp.sum(jnp.exp(sim_lse - m_new),
                                            axis=1, keepdims=True)
    m_sc[...] = m_new

    # Positive-pair similarity sum. Padded label slots hold distinct sentinels
    # (row vs col), so they never match valid labels and padded rows get 0.
    pos = lrow_ref[...] == lcol_tile                           # [tm,1] vs [1,tn]
    msum_sc[...] += jnp.sum(jnp.where(pos, sim, 0.0), axis=1, keepdims=True)

    @pl.when(j == pl.num_programs(1) - 1)
    def _():
        # sum_c pos*log_p = sum_c pos*sim - npos * lse   (per row)
        lse = m_sc[...] + jnp.log(l_sc[...])
        out_ref[...] = msum_sc[...] - npos_ref[...] * lse       # [tm, 1] f32 partials


def _round_up(x, m):
    return ((x + m - 1) // m) * m


# ----------------------------------------------------------------------------
# Wrapper
# ----------------------------------------------------------------------------
def contrastive_loss(features, labels, temperature=0.07, *,
                     use_bf16_matmul=False, tm=None, tn=None):
    """features: [B, D] float, labels: [B] int -> scalar float32 loss.

    tm/tn: similarity-matrix tile. Defaults: 256x256 for B>128 (fills the
    256-wide MXU on v6e/v7x and amortizes per-step overhead), 128x128 otherwise.
    Constraints: tm % 8 == 0, tn % 128 == 0, and one of tm/tn divides the other.
    use_bf16_matmul: bf16 operands / f32 accumulation on the MXU (recommended on
    v5e to halve streamed bytes); changes the loss at ~1e-2 relative level.
    """
    B, D = features.shape

    if tm is None or tn is None:
        t = 256 if B > 128 else 128
        tm = t if tm is None else tm
        tn = t if tn is None else tn
    assert tm % 8 == 0, "tm must be a multiple of 8 (sublanes)"
    assert tn % 128 == 0, "tn must be a multiple of 128 (lanes)"
    big, small = max(tm, tn), min(tm, tn)
    assert big % small == 0, "one of tm/tn must divide the other"

    Bp = _round_up(B, big)                                     # pad batch to tiles
    Dp = _round_up(D, 128)                                     # lane-dense feature dim

    mat_dtype = jnp.bfloat16 if use_bf16_matmul else jnp.float32
    mat_bytes = jnp.dtype(mat_dtype).itemsize
    scale = float(1.0 / math.sqrt(temperature))                # per-operand scale

    # ---- VMEM budget: resident k when it comfortably fits (sized for v7x). ----
    resident_k_bytes = Bp * Dp * mat_bytes
    k_resident = resident_k_bytes <= (16 << 20)
    vmem_est = (2 * tm * Dp * mat_bytes                                  # q (dbl-buffered)
                + (2 * resident_k_bytes if k_resident else 2 * tn * Dp * mat_bytes)
                + 2 * Bp * 4                                             # col labels
                + 2 * 3 * tm * 4                                         # lrow/npos/out
                + 3 * tm * 4                                             # scratch
                + 8 * tm * tn * 4)                                       # f32 temporaries
    vmem_limit = int(min(max(2 * vmem_est, 32 << 20), 56 << 20))

    # ---- pre-pass input: avoid the extra padded f32 copy when tile-aligned. ---
    if (Bp != B) or (Dp != D):
        f_in = jnp.pad(features, ((0, Bp - B), (0, Dp - D)))
    else:
        f_in = features

    prb = big                                                   # divides Bp
    pre_est = 2 * prb * Dp * (jnp.dtype(f_in.dtype).itemsize + mat_bytes)
    pre_limit = int(min(max(2 * pre_est, 32 << 20), 56 << 20))

    fs = pl.pallas_call(
        functools.partial(_normalize_scale_kernel, scale=scale),
        out_shape=jax.ShapeDtypeStruct((Bp, Dp), mat_dtype),
        grid_spec=pltpu.PrefetchScalarGridSpec(
            num_scalar_prefetch=0,
            grid=(Bp // prb,),
            in_specs=[pl.BlockSpec((prb, Dp), lambda i: (i, 0))],
            out_specs=pl.BlockSpec((prb, Dp), lambda i: (i, 0))),
        compiler_params=pltpu.CompilerParams(
            dimension_semantics=("parallel",),
            vmem_limit_bytes=pre_limit),
    )(f_in)

    # ---- labels: both orientations; padded slots get (distinct) sentinels so
    #      padded rows/cols never match valid labels and need no validity mask.
    #      (Assumes user labels never equal INT32_MIN / INT32_MIN+1.)
    labels_i32 = labels.astype(jnp.int32)
    ROW_SENTINEL = jnp.int32(-2147483648)
    COL_SENTINEL = jnp.int32(-2147483647)
    lrow = jnp.full((Bp, 1), ROW_SENTINEL, jnp.int32).at[:B, 0].set(labels_i32)
    lcol = jnp.full((1, Bp), COL_SENTINEL, jnp.int32).at[0, :B].set(labels_i32)

    # Per-row positive counts hoisted out of the kernel (labels-only).
    npos = jnp.sum((labels_i32[:, None] == labels_i32[None, :]).astype(jnp.float32),
                   axis=1)
    npos_pad = jnp.zeros((Bp, 1), jnp.float32).at[:B, 0].set(npos)

    kernel = functools.partial(_contrastive_tile_kernel,
                               n_valid=B, n_padded=Bp, tn=tn,
                               k_resident=k_resident)

    if k_resident:
        k_spec = pl.BlockSpec((Bp, Dp), lambda i, j: (0, 0))    # resident slab
    else:
        k_spec = pl.BlockSpec((tn, Dp), lambda i, j: (j, 0))    # streamed tiles

    partials = pl.pallas_call(
        kernel,
        out_shape=jax.ShapeDtypeStruct((Bp, 1), jnp.float32),
        grid_spec=pltpu.PrefetchScalarGridSpec(
            num_scalar_prefetch=0,
            grid=(Bp // tm, Bp // tn),
            in_specs=[
                pl.BlockSpec((tm, Dp), lambda i, j: (i, 0)),    # q row slab
                k_spec,                                         # k (resident/streamed)
                pl.BlockSpec((tm, 1), lambda i, j: (i, 0)),     # row labels
                pl.BlockSpec((1, Bp), lambda i, j: (0, 0)),     # col labels (resident)
                pl.BlockSpec((tm, 1), lambda i, j: (i, 0)),     # per-row positive count
            ],
            out_specs=pl.BlockSpec((tm, 1), lambda i, j: (i, 0)),
            scratch_shapes=[pltpu.VMEM((tm, 1), jnp.float32)    # m, l, msum
                            for _ in range(3)]),
        compiler_params=pltpu.CompilerParams(
            dimension_semantics=("parallel", "arbitrary"),
            vmem_limit_bytes=vmem_limit),
    )(fs, fs, lrow, lcol, npos_pad)

    # Padded rows contribute exactly 0; mean over the B*B valid entries.
    return -jnp.sum(partials) / (B * B)


# ----------------------------------------------------------------------------
# Pure-JAX reference (matches the PyTorch module semantics).
# ----------------------------------------------------------------------------
def _reference_loss(features, labels, temperature=0.07):
    f = features.astype(jnp.float32)
    f = f / jnp.maximum(jnp.linalg.norm(f, axis=1, keepdims=True), 1e-12)
    sim = jnp.matmul(f, f.T, precision=jax.lax.Precision.HIGHEST) / temperature
    log_p = jax.nn.log_softmax(sim, axis=1)
    pos = (labels[None, :] == labels[:, None]).astype(jnp.float32)
    return -jnp.mean(pos * log_p)


if __name__ == "__main__":
    root = jax.random.PRNGKey(0)
    k1, k2, k3, k4, k5, k6 = jax.random.split(root, 6)

    # Case 1: tiny single-tile case (B < tile, exercises padded rows/cols).
    B, D = 8, 32
    features = jax.random.normal(k1, (B, D), dtype=jnp.float32)
    labels = jax.random.randint(k2, (B,), 0, 4, dtype=jnp.int32)
    ref1 = _reference_loss(features, labels, 0.07)
    out1 = jax.block_until_ready(contrastive_loss(features, labels, 0.07))
    assert jnp.allclose(out1, ref1, rtol=1e-3, atol=1e-3), (float(out1), float(ref1))

    # Case 2: multi-tile, tile-aligned (no-padding trace specialization), grid 2x2.
    B2, D2 = 256, 64
    f2 = jax.random.normal(k3, (B2, D2), dtype=jnp.float32)
    l2 = jax.random.randint(k4, (B2,), 0, 7, dtype=jnp.int32)
    ref2 = _reference_loss(f2, l2, 0.07)
    out2 = jax.block_until_ready(contrastive_loss(f2, l2, 0.07, tm=128, tn=128))
    assert jnp.allclose(out2, ref2, rtol=1e-3, atol=1e-3), (float(out2), float(ref2))

    # Case 3: multi-tile with padding (B not tile-aligned), grid 3x3, online-LSE
    # recurrence across column tiles; also the bf16 MXU fast path.
    B3, D3 = 300, 64
    f3 = jax.random.normal(k5, (B3, D3), dtype=jnp.float32)
    l3 = jax.random.randint(k6, (B3,), 0, 7, dtype=jnp.int32)
    ref3 = _reference_loss(f3, l3, 0.07)
    out3 = jax.block_until_ready(contrastive_loss(f3, l3, 0.07, tm=128, tn=128))
    assert jnp.allclose(out3, ref3, rtol=1e-3, atol=1e-3), (float(out3), float(ref3))

    out3_bf16 = jax.block_until_ready(
        contrastive_loss(f3, l3, 0.07, use_bf16_matmul=True, tm=128, tn=128))
    assert jnp.allclose(out3_bf16, ref3, rtol=5e-2, atol=5e-2), (float(out3_bf16),
                                                                 float(ref3))

    print("KERNEL_OK")
</pallas_src>

<mosaic_0001>
module attributes {stable_mosaic.version = 11 : i64} {
  func.func @_normalize_scale_kernel(%arg0: i32, %arg1: memref<128x128xf32, #tpu.memory_space<vmem>>, %arg2: memref<128x128xf32, #tpu.memory_space<vmem>>) attributes {dimension_semantics = [#tpu.dimension_semantics<parallel>], iteration_bounds = array<i64: 1>, scalar_prefetch = 0 : i64, scratch_operands = 0 : i64, tpu.core_type = #tpu.core_type<tc>, window_params = [{transform_indices = @transform_0, window_bounds = array<i64: 128, 128>}, {transform_indices = @transform_1, window_bounds = array<i64: 128, 128>}]} {
    %c0 = arith.constant 0 : index
    %c0_0 = arith.constant 0 : index
    %0 = vector.load %arg1[%c0, %c0_0] : memref<128x128xf32, #tpu.memory_space<vmem>>, vector<128x128xf32>
    %1 = arith.mulf %0, %0 : vector<128x128xf32>
    %cst = arith.constant dense<0.000000e+00> : vector<128xf32>
    %2 = vector.multi_reduction <add>, %1, %cst [1] : vector<128x128xf32> to vector<128xf32>
    %3 = vector.shape_cast %2 : vector<128xf32> to vector<128x1xf32>
    %cst_1 = arith.constant 1.000000e-24 : f32
    %4 = vector.broadcast %cst_1 : f32 to vector<128x1xf32>
    %5 = arith.maximumf %3, %4 : vector<128x1xf32>
    %6 = math.rsqrt %5 : vector<128x1xf32>
    %cst_2 = arith.constant 3.77964473 : f32
    %7 = vector.broadcast %cst_2 : f32 to vector<128x1xf32>
    %8 = arith.mulf %6, %7 : vector<128x1xf32>
    %9 = vector.broadcast %8 : vector<128x1xf32> to vector<128x128xf32>
    %10 = arith.mulf %0, %9 : vector<128x128xf32>
    %c0_3 = arith.constant 0 : index
    %c0_4 = arith.constant 0 : index
    %11 = vector.load %arg2[%c0_3, %c0_4] : memref<128x128xf32, #tpu.memory_space<vmem>>, vector<128x128xf32>
    tpu.vector_store %arg2[%c0_3, %c0_4], %10 {strides = array<i32>} : memref<128x128xf32, #tpu.memory_space<vmem>>, vector<128x128xf32>,
    return
  }
  func.func @transform_0(%arg0: i32) -> (i32, i32) {
    %c0_i32 = arith.constant 0 : i32
    %c0_i32_0 = arith.constant 0 : i32
    return %arg0, %c0_i32 : i32, i32
  }
  func.func @transform_1(%arg0: i32) -> (i32, i32) {
    %c0_i32 = arith.constant 0 : i32
    %c0_i32_0 = arith.constant 0 : i32
    return %arg0, %c0_i32 : i32, i32
  }
}

</mosaic_0001>

<bundles_post_ra>
// kernel: tpu_custom_call.1
= control target key start
LH: loop header
LB: loop body
LE: loop exit
PB: predicated region body
PF: predicated region fallthrough
CT: control target
= control target key end

     0   :  { %6 = vsyncpa [#allocation3], 0  ;;  %s370_s0 = inlined_call_operand.hbm [shape: f32[128,128], index: 0, kind: input, shape index: {}]   ;;  %s371_s1 = inlined_call_operand.hbm [shape: f32[128,128], index: 1, kind: output, shape index: {}]  }
   0x1   :  { %7 = vsyncpa [#allocation4], 0  ;;  %s264_s6 = smov [#allocation2]  }
   0x2   :  { %s13_s7 = sshll.u32 %s264_s6, 4  ;;  %s14_s7 = int_to_ptr.vmem [resolvable:$true] %s13_s7 }
   0x3   :  { %s228_s8 = scalar_lea.vmem %s14_s7, 2048  ;;  %p233_p1 = scmp.lt.s32.totalorder %s14_s7, %s14_s7 }
   0x4   :  { %p229_p0 = scmp.ne.s32.totalorder %s14_s7, %s228_s8  ;;  %p234_p2 = scmp.lt.s32.totalorder %s228_s8, %s228_s8 }
   0x6   :  { %p235_p3 = por %p234_p2, %p233_p1 }
   0x8   :  { %p236_p4 = pnand %p235_p3, %p229_p0 }
   0xa   :  { %239 = shalt.err (!%p236_p4)
}
   0xb   :  { %s265_s9 = smov 128   ;;  %s266_s10 = smov 8  }
   0xc   :  { %19 = dma.hbm_to_vmem [thread:$0]  %s370_s0, 2048, %s14_s7, [#allocation3], %s265_s9, %s265_s9, %s266_s10  }
   0xd   :  { %260 = dma.done.wait [#allocation3], 2048  }
   0xe   :  { %261 = vsyncadd [#allocation3], 4294965248  ;;  %v284_v0 = vld [vmem:[#allocation2 + $0x10] sm:$0xff]  ;;  %v286_v1 = vld [vmem:[#allocation2] sm:$0xff]  ;;  %s267_s0 = smov [#allocation5]  }
   0xf   :  { %v288_v2 = vld [vmem:[#allocation2 + $0x18] sm:$0xff]  ;;  %v41_v3 = vmul.f32 %v284_v0, %v284_v0  ;;  %v39_v4 = vmul.f32 %v286_v1, %v286_v1  ;;  %v294_v5 = vld [vmem:[#allocation2 + $0x8] sm:$0xff]  ;;  %v302_v9 = vld [vmem:[#allocation2 + $0x20] sm:$0xff]  ;;  %s172_s13 = sshll.u32 %s267_s0, 4  ;;  %s173_s13 = int_to_ptr.vmem [resolvable:$true] %s172_s13 }
  0x10   :  { %v42_v6 = vmul.f32 %v288_v2, %v288_v2  ;;  %v40_v7 = vmul.f32 %v294_v5, %v294_v5  ;;  %v300_v8 = vld [vmem:[#allocation2 + $0x28] sm:$0xff]  ;;  %v43_v11 = vmul.f32 %v302_v9, %v302_v9  ;;  %v308_v12 = vld [vmem:[#allocation2 + $0x38] sm:$0xff]  ;;  %v310_v13 = vld [vmem:[#allocation2 + $0x30] sm:$0xff]  ;;  %s240_s14 = scalar_lea.vmem %s173_s13, 2048  ;;  %p245_p6 = scmp.lt.s32.totalorder %s173_s13, %s173_s13 }
  0x11   :  { %59 = vadd.xlane.f32.xlu1 %v41_v3  ;;  %55 = vadd.xlane.f32.xlu0 %v39_v4  ;;  %v44_v10 = vmul.f32 %v300_v8, %v300_v8  ;;  %v46_v14 = vmul.f32 %v308_v12, %v308_v12  ;;  %v45_v15 = vmul.f32 %v310_v13, %v310_v13  ;;  %v316_v16 = vld [vmem:[#allocation2 + $0x48] sm:$0xff]  ;;  %v318_v17 = vld [vmem:[#allocation2 + $0x40] sm:$0xff]  ;;  %v324_v20 = vld [vmem:[#allocation2 + $0x58] sm:$0xff]  ;;  %p241_p5 = scmp.ne.s32.totalorder %s173_s13, %s240_s14  ;;  %p246_p7 = scmp.lt.s32.totalorder %s240_s14, %s240_s14 }
  0x12   :  { %v48_v18 = vmul.f32 %v316_v16, %v316_v16  ;;  %v47_v19 = vmul.f32 %v318_v17, %v318_v17  ;;  %v326_v21 = vld [vmem:[#allocation2 + $0x50] sm:$0xff]  ;;  %v50_v22 = vmul.f32 %v324_v20, %v324_v20  ;;  %v332_v24 = vld [vmem:[#allocation2 + $0x68] sm:$0xff]  ;;  %v334_v25 = vld [vmem:[#allocation2 + $0x60] sm:$0xff] }
  0x13   :  { %v49_v23 = vmul.f32 %v326_v21, %v326_v21  ;;  %v52_v26 = vmul.f32 %v332_v24, %v332_v24  ;;  %v51_v27 = vmul.f32 %v334_v25, %v334_v25  ;;  %v340_v28 = vld [vmem:[#allocation2 + $0x78] sm:$0xff]  ;;  %v342_v29 = vld [vmem:[#allocation2 + $0x70] sm:$0xff]  ;;  %p247_p8 = por %p246_p7, %p245_p6 }
  0x14   :  { %v54_v30 = vmul.f32 %v340_v28, %v340_v28  ;;  %v53_v31 = vmul.f32 %v342_v29, %v342_v29 }
  0x15   :  { %61 = vadd.xlane.f32.xlu1 %v42_v6  ;;  %57 = vadd.xlane.f32.xlu0 %v40_v7  ;;  %p248_p9 = pnand %p247_p8, %p241_p5 }
  0x19   :  { %65 = vadd.xlane.f32.xlu1 %v44_v10  ;;  %63 = vadd.xlane.f32.xlu0 %v43_v11 }
  0x1d   :  { %69 = vadd.xlane.f32.xlu1 %v46_v14  ;;  %67 = vadd.xlane.f32.xlu0 %v45_v15 }
  0x21   :  { %73 = vadd.xlane.f32.xlu1 %v48_v18  ;;  %71 = vadd.xlane.f32.xlu0 %v47_v19 }
  0x25   :  { %77 = vadd.xlane.f32.xlu1 %v50_v22  ;;  %75 = vadd.xlane.f32.xlu0 %v49_v23 }
  0x29   :  { %81 = vadd.xlane.f32.xlu1 %v52_v26  ;;  %79 = vadd.xlane.f32.xlu0 %v51_v27 }
  0x2d   :  { %85 = vadd.xlane.f32.xlu1 %v54_v30  ;;  %83 = vadd.xlane.f32.xlu0 %v53_v31 }
  0x9a   :  { %v60_v32 = vpop.xlane.xlu1 %59  ;;  %v56_v33 = vpop.xlane.xlu0 %55 }
  0x9b   :  { %v89_v34 = vmax.f32 %v60_v32, 1e-24  ;;  %v87_v35 = vmax.f32 %v56_v33, 1e-24 }
  0x9d   :  { %188 = vrsqrt.f32 %v89_v34 }
  0x9e   :  { %190 = vrsqrt.f32 %v87_v35  ;;  %v62_v36 = vpop.xlane.xlu1 %61  ;;  %v58_v37 = vpop.xlane.xlu0 %57 }
  0x9f   :  { %v90_v38 = vmax.f32 %v62_v36, 1e-24  ;;  %v88_v39 = vmax.f32 %v58_v37, 1e-24 }
  0xa1   :  { %192 = vrsqrt.f32 %v90_v38 }
  0xa2   :  { %194 = vrsqrt.f32 %v88_v39  ;;  %v66_v40 = vpop.xlane.xlu1 %65  ;;  %v64_v41 = vpop.xlane.xlu0 %63 }
  0xa3   :  { %v92_v42 = vmax.f32 %v66_v40, 1e-24  ;;  %v91_v43 = vmax.f32 %v64_v41, 1e-24 }
  0xa5   :  { %196 = vrsqrt.f32 %v92_v42 }
  0xa6   :  { %198 = vrsqrt.f32 %v91_v43  ;;  %v70_v44 = vpop.xlane.xlu1 %69  ;;  %v68_v45 = vpop.xlane.xlu0 %67 }
  0xa7   :  { %v94_v46 = vmax.f32 %v70_v44, 1e-24  ;;  %v93_v47 = vmax.f32 %v68_v45, 1e-24 }
  0xa9   :  { %200 = vrsqrt.f32 %v94_v46 }
  0xaa   :  { %v189_v48 = vpop.eup %188  ;;  %202 = vrsqrt.f32 %v93_v47  ;;  %v74_v49 = vpop.xlane.xlu1 %73 }
  0xab   :  { %v72_v50 = vpop.xlane.xlu0 %71  ;;  %v191_v51 = vpop.eup %190  ;;  %v121_v52 = vmul.f32 3.7796447, %v189_v48  ;;  %v96_v53 = vmax.f32 %v74_v49, 1e-24 }
  0xac   :  { %v95_v54 = vmax.f32 %v72_v50, 1e-24  ;;  %v119_v55 = vmul.f32 3.7796447, %v191_v51 }
  0xad   :  { %v137_v56 = vmul.f32 %v121_v52, %v284_v0  ;;  %204 = vrsqrt.f32 %v96_v53 }
  0xae   :  { %v193_v57 = vpop.eup %192  ;;  %v135_v58 = vmul.f32 %v119_v55, %v286_v1  ;;  %206 = vrsqrt.f32 %v95_v54  ;;  %v78_v59 = vpop.xlane.xlu1 %77 }
  0xaf   :  { %v76_v60 = vpop.xlane.xlu0 %75  ;;  %v195_v61 = vpop.eup %194  ;;  %153 = vst [vmem:[#allocation5 + $0x10] sm:$0xff] %v137_v56  ;;  %v122_v62 = vmul.f32 3.7796447, %v193_v57  ;;  %v98_v63 = vmax.f32 %v78_v59, 1e-24 }
  0xb0   :  { %v97_v3 = vmax.f32 %v76_v60, 1e-24  ;;  %151 = vst [vmem:[#allocation5] sm:$0xff] %v135_v58  ;;  %v120_v4 = vmul.f32 3.7796447, %v195_v61 }
  0xb1   :  { %v138_v6 = vmul.f32 %v122_v62, %v288_v2  ;;  %208 = vrsqrt.f32 %v98_v63 }
  0xb2   :  { %v197_v7 = vpop.eup %196  ;;  %v136_v0 = vmul.f32 %v120_v4, %v294_v5  ;;  %210 = vrsqrt.f32 %v97_v3  ;;  %v82_v10 = vpop.xlane.xlu1 %81 }
  0xb3   :  { %v80_v11 = vpop.xlane.xlu0 %79  ;;  %v199_v1 = vpop.eup %198  ;;  %154 = vst [vmem:[#allocation5 + $0x18] sm:$0xff] %v138_v6  ;;  %v124_v14 = vmul.f32 3.7796447, %v197_v7  ;;  %v100_v15 = vmax.f32 %v82_v10, 1e-24 }
  0xb4   :  { %v99_v18 = vmax.f32 %v80_v11, 1e-24  ;;  %152 = vst [vmem:[#allocation5 + $0x8] sm:$0xff] %v136_v0  ;;  %v123_v19 = vmul.f32 3.7796447, %v199_v1 }
  0xb5   :  { %v140_v22 = vmul.f32 %v124_v14, %v300_v8  ;;  %212 = vrsqrt.f32 %v100_v15 }
  0xb6   :  { %v201_v23 = vpop.eup %200  ;;  %v139_v2 = vmul.f32 %v123_v19, %v302_v9  ;;  %214 = vrsqrt.f32 %v99_v18  ;;  %v86_v26 = vpop.xlane.xlu1 %85 }
  0xb7   :  { %v84_v27 = vpop.xlane.xlu0 %83  ;;  %v203_v5 = vpop.eup %202  ;;  %156 = vst [vmem:[#allocation5 + $0x28] sm:$0xff] %v140_v22  ;;  %v126_v30 = vmul.f32 3.7796447, %v201_v23  ;;  %v102_v31 = vmax.f32 %v86_v26, 1e-24 }
  0xb8   :  { %v101_v32 = vmax.f32 %v84_v27, 1e-24  ;;  %155 = vst [vmem:[#allocation5 + $0x20] sm:$0xff] %v139_v2  ;;  %v125_v33 = vmul.f32 3.7796447, %v203_v5 }
  0xb9   :  { %v142_v34 = vmul.f32 %v126_v30, %v308_v12  ;;  %216 = vrsqrt.f32 %v102_v31 }
  0xba   :  { %v205_v35 = vpop.eup %204  ;;  %v141_v8 = vmul.f32 %v125_v33, %v310_v13  ;;  %218 = vrsqrt.f32 %v101_v32 }
  0xbb   :  { %v207_v36 = vpop.eup %206  ;;  %158 = vst [vmem:[#allocation5 + $0x38] sm:$0xff] %v142_v34  ;;  %v128_v9 = vmul.f32 3.7796447, %v205_v35 }
  0xbc   :  { %157 = vst [vmem:[#allocation5 + $0x30] sm:$0xff] %v141_v8  ;;  %v127_v37 = vmul.f32 3.7796447, %v207_v36 }
  0xbd   :  { %v144_v38 = vmul.f32 %v128_v9, %v316_v16 }
  0xbe   :  { %v209_v39 = vpop.eup %208  ;;  %v143_v40 = vmul.f32 %v127_v37, %v318_v17 }
  0xbf   :  { %v211_v41 = vpop.eup %210  ;;  %160 = vst [vmem:[#allocation5 + $0x48] sm:$0xff] %v144_v38  ;;  %v130_v42 = vmul.f32 3.7796447, %v209_v39 }
  0xc0   :  { %159 = vst [vmem:[#allocation5 + $0x40] sm:$0xff] %v143_v40  ;;  %v129_v12 = vmul.f32 3.7796447, %v211_v41 }
  0xc1   :  { %v146_v43 = vmul.f32 %v130_v42, %v324_v20 }
  0xc2   :  { %v213_v44 = vpop.eup %212  ;;  %v145_v13 = vmul.f32 %v129_v12, %v326_v21 }
  0xc3   :  { %v215_v45 = vpop.eup %214  ;;  %162 = vst [vmem:[#allocation5 + $0x58] sm:$0xff] %v146_v43  ;;  %v132_v46 = vmul.f32 3.7796447, %v213_v44 }
  0xc4   :  { %161 = vst [vmem:[#allocation5 + $0x50] sm:$0xff] %v145_v13  ;;  %v131_v47 = vmul.f32 3.7796447, %v215_v45 }
  0xc5   :  { %v148_v16 = vmul.f32 %v132_v46, %v332_v24 }
  0xc6   :  { %v217_v48 = vpop.eup %216  ;;  %v147_v17 = vmul.f32 %v131_v47, %v334_v25 }
  0xc7   :  { %v219_v49 = vpop.eup %218  ;;  %164 = vst [vmem:[#allocation5 + $0x68] sm:$0xff] %v148_v16  ;;  %v134_v50 = vmul.f32 3.7796447, %v217_v48 }
  0xc8   :  { %163 = vst [vmem:[#allocation5 + $0x60] sm:$0xff] %v147_v17  ;;  %v133_v20 = vmul.f32 3.7796447, %v219_v49 }
  0xc9   :  { %v150_v51 = vmul.f32 %v134_v50, %v340_v28 }
  0xca   :  { %v149_v21 = vmul.f32 %v133_v20, %v342_v29 }
  0xcb   :  { %166 = vst [vmem:[#allocation5 + $0x78] sm:$0xff] %v150_v51 }
  0xcc   :  { %165 = vst [vmem:[#allocation5 + $0x70] sm:$0xff] %v149_v21 }
  0xcd   :  { %251 = shalt.err (!%p248_p9)
}
  0xce   :  { %178 = dma.vmem_to_hbm [thread:$0]  %s173_s13, 2048, %s371_s1, [#allocation4], %s265_s9, %s265_s9, %s266_s10  }
  0xcf   :  { %262 = dma.done.wait [#allocation4], 2048  }
  0xd0   :  { %263 = vsyncadd [#allocation4], 4294965248 }
  0xd1   :  { %182 = vsyncpa [#allocation3], 1 }
  0xd2   :  { %183 = vsyncpa [#allocation4], 1 }

</bundles_post_ra>
